<compile_context>
chip_gen: v5e
topology: v5e:2x2
jax: 0.10.0
libtpu: 0.0.40
codegen_flags: <defaults>
</compile_context>

<pallas_src>
import functools

import jax
import jax.numpy as jnp
from jax.experimental import pallas as pl
from jax.experimental.pallas import tpu as pltpu


# ---------------------------------------------------------------------------
# Kernels
# ---------------------------------------------------------------------------

def _xw_kernel(x_ref, w_ref, o_ref):
    # o = X_tile @ W  (MXU, f32 accumulate, store in compute dtype)
    o_ref[...] = jnp.dot(
        x_ref[...], w_ref[...], preferred_element_type=jnp.float32
    ).astype(o_ref.dtype)


def _agg_softmax_w2_kernel(a_ref, xw_ref, b_ref, w2_ref, o_ref, acc_ref, *,
                           valid_cols):
    # acc += A_tile(i,k) @ XW1(k);  at last k: +b1, softmax over features, @W2
    k = pl.program_id(1)

    @pl.when(k == 0)
    def _init():
        acc_ref[...] = jnp.zeros_like(acc_ref)

    acc_ref[...] += jnp.dot(
        a_ref[...], xw_ref[...], preferred_element_type=jnp.float32
    )

    @pl.when(k == pl.num_programs(1) - 1)
    def _finalize():
        h = acc_ref[...] + b_ref[...]                       # f32
        # Mask padded hidden lanes so they do not pollute softmax(dim=1).
        col = jax.lax.broadcasted_iota(jnp.int32, h.shape, 1)
        h = jnp.where(col < valid_cols, h, -jnp.inf)
        m = jnp.max(h, axis=1, keepdims=True)
        e = jnp.exp(h - m)
        denom = jnp.sum(e, axis=1, keepdims=True)
        p = e * pl.reciprocal(denom, approx=True)           # EUP vrcp
        o_ref[...] = jnp.dot(
            p.astype(w2_ref.dtype), w2_ref[...],
            preferred_element_type=jnp.float32,
        ).astype(o_ref.dtype)


def _agg_bias_kernel(a_ref, m_ref, b_ref, o_ref, acc_ref):
    # acc += A_tile(i,k) @ M(k);  at last k: + b2
    k = pl.program_id(1)

    @pl.when(k == 0)
    def _init():
        acc_ref[...] = jnp.zeros_like(acc_ref)

    acc_ref[...] += jnp.dot(
        a_ref[...], m_ref[...], preferred_element_type=jnp.float32
    )

    @pl.when(k == pl.num_programs(1) - 1)
    def _finalize():
        o_ref[...] = (acc_ref[...] + b_ref[...]).astype(o_ref.dtype)


# ---------------------------------------------------------------------------
# Wrapper
# ---------------------------------------------------------------------------

def _round_up(x, m):
    return (x + m - 1) // m * m


def _pad2(a, rows, cols, dtype):
    out = jnp.zeros((rows, cols), dtype)
    return out.at[: a.shape[0], : a.shape[1]].set(a.astype(dtype))


def node_gcn_pallas(a_hat, x, w1, b1, w2, b2, *, tile_m=128, tile_k=128,
                    compute_dtype=jnp.bfloat16,
                    vmem_limit_bytes=48 * 1024 * 1024):
    n, in_ch = x.shape
    hid = w1.shape[1]
    out_ch = w2.shape[1]
    b1 = b1.reshape(1, -1)
    b2 = b2.reshape(1, -1)

    # Lane-dense padding: feature dims -> multiple of 128; nodes -> tile size.
    tile_m = min(tile_m, _round_up(n, 128))
    tile_k = min(tile_k, _round_up(n, 128))
    n_pad = _round_up(n, max(tile_m, tile_k))
    assert n_pad % tile_m == 0 and n_pad % tile_k == 0
    in_pad = _round_up(in_ch, 128)
    hid_pad = _round_up(hid, 128)
    out_pad = _round_up(out_ch, 128)

    a_p = _pad2(a_hat, n_pad, n_pad, compute_dtype)
    x_p = _pad2(x, n_pad, in_pad, compute_dtype)
    w1_p = _pad2(w1, in_pad, hid_pad, compute_dtype)
    w2_p = _pad2(w2, hid_pad, out_pad, compute_dtype)
    b1_p = _pad2(b1, 1, hid_pad, jnp.float32)
    b2_p = _pad2(b2, 1, out_pad, jnp.float32)

    grid_m = n_pad // tile_m
    grid_k = n_pad // tile_k

    # --- 1) XW1 = X @ W1 -----------------------------------------------------
    xw1 = pl.pallas_call(
        _xw_kernel,
        out_shape=jax.ShapeDtypeStruct((n_pad, hid_pad), compute_dtype),
        grid=(grid_m,),
        in_specs=[
            pl.BlockSpec((tile_m, in_pad), lambda i: (i, 0)),
            pl.BlockSpec((in_pad, hid_pad), lambda i: (0, 0)),   # resident
        ],
        out_specs=pl.BlockSpec((tile_m, hid_pad), lambda i: (i, 0)),
        compiler_params=pltpu.CompilerParams(
            dimension_semantics=("parallel",),
            vmem_limit_bytes=vmem_limit_bytes,
        ),
    )(x_p, w1_p)

    # --- 2) HW2 = softmax(A_hat @ XW1 + b1, dim=1) @ W2 ----------------------
    hw2 = pl.pallas_call(
        functools.partial(_agg_softmax_w2_kernel, valid_cols=hid),
        out_shape=jax.ShapeDtypeStruct((n_pad, out_pad), compute_dtype),
        grid=(grid_m, grid_k),
        in_specs=[
            pl.BlockSpec((tile_m, tile_k), lambda i, k: (i, k)),
            pl.BlockSpec((tile_k, hid_pad), lambda i, k: (k, 0)),
            pl.BlockSpec((1, hid_pad), lambda i, k: (0, 0)),      # resident
            pl.BlockSpec((hid_pad, out_pad), lambda i, k: (0, 0)),  # resident
        ],
        out_specs=pl.BlockSpec((tile_m, out_pad), lambda i, k: (i, 0)),
        scratch_shapes=[pltpu.VMEM((tile_m, hid_pad), jnp.float32)],
        compiler_params=pltpu.CompilerParams(
            dimension_semantics=("parallel", "arbitrary"),
            vmem_limit_bytes=vmem_limit_bytes,
        ),
    )(a_p, xw1, b1_p, w2_p)

    # --- 3) OUT = A_hat @ HW2 + b2 -------------------------------------------
    out = pl.pallas_call(
        _agg_bias_kernel,
        out_shape=jax.ShapeDtypeStruct((n_pad, out_pad), jnp.float32),
        grid=(grid_m, grid_k),
        in_specs=[
            pl.BlockSpec((tile_m, tile_k), lambda i, k: (i, k)),
            pl.BlockSpec((tile_k, out_pad), lambda i, k: (k, 0)),
            pl.BlockSpec((1, out_pad), lambda i, k: (0, 0)),      # resident
        ],
        out_specs=pl.BlockSpec((tile_m, out_pad), lambda i, k: (i, 0)),
        scratch_shapes=[pltpu.VMEM((tile_m, out_pad), jnp.float32)],
        compiler_params=pltpu.CompilerParams(
            dimension_semantics=("parallel", "arbitrary"),
            vmem_limit_bytes=vmem_limit_bytes,
        ),
    )(a_p, hw2, b2_p)

    return out[:n, :out_ch]


# ---------------------------------------------------------------------------
# Graph preprocessing (plain JAX glue) and reference
# ---------------------------------------------------------------------------

def build_norm_adj(edge_index, num_nodes):
    """Dense D^{-1/2}(A+I)D^{-1/2}; A[dst, src] += 1 per edge src->dst.

    Duplicate edges sum (scatter-add) and self loops are only added for nodes
    that do not already have one, matching torch_geometric's gcn_norm /
    add_remaining_self_loops behavior.
    """
    src, dst = edge_index[0], edge_index[1]
    a = jnp.zeros((num_nodes, num_nodes), jnp.float32).at[dst, src].add(1.0)
    diag = jnp.diagonal(a)
    a = a + jnp.diag(jnp.where(diag == 0.0, 1.0, 0.0))
    deg = jnp.sum(a, axis=1)
    dinv = jnp.where(deg > 0, 1.0 / jnp.sqrt(deg), 0.0)
    return dinv[:, None] * a * dinv[None, :]


def node_gcn_ref(a_hat, x, w1, b1, w2, b2):
    h = a_hat @ (x @ w1) + b1
    h = jax.nn.softmax(h, axis=1)
    return a_hat @ (h @ w2) + b2


# ---------------------------------------------------------------------------
# Self-test
# ---------------------------------------------------------------------------

if __name__ == "__main__":
    key = jax.random.PRNGKey(0)
    num_nodes = 16
    in_channels, hidden_channels, out_channels = 8, 32, 8

    k_x, k_w1, k_b1, k_w2, k_b2, _ = jax.random.split(key, 6)

    # Node features
    x = jax.random.normal(k_x, (num_nodes, in_channels), jnp.float32)

    # Deterministic edge list: ring graph (both directions) -> edge_index [2, E]
    idx = jnp.arange(num_nodes)
    src = jnp.concatenate([idx, (idx + 1) % num_nodes])
    dst = jnp.concatenate([(idx + 1) % num_nodes, idx])
    edge_index = jnp.stack([src, dst], axis=0).astype(jnp.int32)

    # Deterministic params (GCNConv: weight (F_in, F_out), bias (F_out,))
    w1 = jax.random.normal(k_w1, (in_channels, hidden_channels), jnp.float32) * 0.1
    b1 = jax.random.normal(k_b1, (1, hidden_channels), jnp.float32) * 0.1
    w2 = jax.random.normal(k_w2, (hidden_channels, out_channels), jnp.float32) * 0.1
    b2 = jax.random.normal(k_b2, (1, out_channels), jnp.float32) * 0.1

    a_hat = build_norm_adj(edge_index, num_nodes)

    out = node_gcn_pallas(a_hat, x, w1, b1, w2, b2)
    out = jax.block_until_ready(out)

    ref = node_gcn_ref(a_hat, x, w1, b1, w2, b2)
    assert out.shape == (num_nodes, out_channels)
    # Tolerance deliberately loosened for bf16 operands + approx reciprocal.
    assert jnp.allclose(out, ref, atol=1e-2, rtol=1e-2), (
        float(jnp.max(jnp.abs(out - ref)))
    )

    print("KERNEL_OK")
</pallas_src>

<mosaic_0001>
module attributes {stable_mosaic.version = 11 : i64} {
  func.func @_xw_kernel(%arg0: i32, %arg1: memref<128x128xbf16, #tpu.memory_space<vmem>>, %arg2: memref<128x128xbf16, #tpu.memory_space<vmem>>, %arg3: memref<128x128xbf16, #tpu.memory_space<vmem>>) attributes {dimension_semantics = [#tpu.dimension_semantics<parallel>], iteration_bounds = array<i64: 1>, scalar_prefetch = 0 : i64, scratch_operands = 0 : i64, tpu.core_type = #tpu.core_type<tc>, window_params = [{transform_indices = @transform_0, window_bounds = array<i64: 128, 128>}, {pipeline_mode = #tpu.pipeline_mode<synchronous>, transform_indices = @transform_1, window_bounds = array<i64: 128, 128>}, {transform_indices = @transform_2, window_bounds = array<i64: 128, 128>}]} {
    %c0 = arith.constant 0 : index
    %c0_0 = arith.constant 0 : index
    %0 = vector.load %arg1[%c0, %c0_0] : memref<128x128xbf16, #tpu.memory_space<vmem>>, vector<128x128xbf16>
    %c0_1 = arith.constant 0 : index
    %c0_2 = arith.constant 0 : index
    %1 = vector.load %arg2[%c0_1, %c0_2] : memref<128x128xbf16, #tpu.memory_space<vmem>>, vector<128x128xbf16>
    %cst = arith.constant dense<0.000000e+00> : vector<128x128xf32>
    %2 = tpu.matmul %0, %1, %cst {dimension_numbers = #tpu.dot_dimension_numbers<[1], [0], [0], [1], [0, 0, 1, 1], [], []>} : vector<128x128xbf16>, vector<128x128xbf16>, vector<128x128xf32> -> vector<128x128xf32>
    %3 = arith.truncf %2 : vector<128x128xf32> to vector<128x128xbf16>
    %c0_3 = arith.constant 0 : index
    %c0_4 = arith.constant 0 : index
    %4 = vector.load %arg3[%c0_3, %c0_4] : memref<128x128xbf16, #tpu.memory_space<vmem>>, vector<128x128xbf16>
    tpu.vector_store %arg3[%c0_3, %c0_4], %3 {strides = array<i32>} : memref<128x128xbf16, #tpu.memory_space<vmem>>, vector<128x128xbf16>,
    return
  }
  func.func @transform_0(%arg0: i32) -> (i32, i32) {
    %c0_i32 = arith.constant 0 : i32
    %c0_i32_0 = arith.constant 0 : i32
    return %arg0, %c0_i32 : i32, i32
  }
  func.func @transform_1(%arg0: i32) -> (i32, i32) {
    %c0_i32 = arith.constant 0 : i32
    %c0_i32_0 = arith.constant 0 : i32
    %c0_i32_1 = arith.constant 0 : i32
    return %c0_i32, %c0_i32_0 : i32, i32
  }
  func.func @transform_2(%arg0: i32) -> (i32, i32) {
    %c0_i32 = arith.constant 0 : i32
    %c0_i32_0 = arith.constant 0 : i32
    return %arg0, %c0_i32 : i32, i32
  }
}

</mosaic_0001>

<bundles_post_ra>
// kernel: tpu_custom_call.1
= control target key start
LH: loop header
LB: loop body
LE: loop exit
PB: predicated region body
PF: predicated region fallthrough
CT: control target
= control target key end

     0   :  { %7 = vsyncpa [#allocation3], 0  ;;  %s545_s0 = inlined_call_operand.hbm [shape: bf16[128,128], index: 0, kind: input, shape index: {}]   ;;  %s546_s1 = inlined_call_operand.hbm [shape: bf16[128,128], index: 1, kind: input, shape index: {}]   ;;  %s547_s2 = inlined_call_operand.hbm [shape: bf16[128,128], index: 2, kind: output, shape index: {}]  }
   0x1   :  { %8 = vsyncpa [#allocation6], 0 }
   0x2   :  { %9 = vsyncpa [#allocation4], 0  ;;  %s14_s11 = sshll.u32 %s545_s0, 4  ;;  %s507_s12 = smov [#allocation2]   ;;  %s15_s11 = int_to_ptr.hbm [resolvable:$true] %s14_s11 }
   0x3   :  { %s16_s13 = sshll.u32 %s507_s12, 4  ;;  %s27_s16 = sshll.u32 %s546_s1, 4  ;;  %s17_s13 = int_to_ptr.vmem [resolvable:$true] %s16_s13  ;;  %s28_s16 = int_to_ptr.hbm [resolvable:$true] %s27_s16 }
   0x4   :  { %s508_s17 = smov 64   ;;  %s509_s18 = smov 4  }
   0x5   :  { %22 = dma.hbm_to_vmem [thread:$0]  %s15_s11, 1024, %s17_s13, [#allocation3], %s508_s17, %s508_s17, %s509_s18  }
   0x6   :  { %s510_s19 = smov [#allocation5]  }
   0x7   :  { %s29_s20 = sshll.u32 %s510_s19, 4  ;;  %s30_s20 = int_to_ptr.vmem [resolvable:$true] %s29_s20 }
   0x8   :  { %35 = dma.hbm_to_vmem [thread:$0]  %s28_s16, 1024, %s30_s20, [#allocation6], %s508_s17, %s508_s17, %s509_s18  }
   0x9   :  { %501 = dma.done.wait [#allocation3], 1024  }
   0xa   :  { %502 = vsyncadd [#allocation3], 4294966272 }
   0xb   :  { %503 = dma.done.wait [#allocation6], 1024  }
   0xc   :  { %504 = vsyncadd [#allocation6], 4294966272  ;;  %v352_v0 = vld [vmem:[#allocation5 + $0x38] sm:$0xff]  ;;  %v351_v1 = vld [vmem:[#allocation5 + $0x30] sm:$0xff]  ;;  %s511_s0 = smov [#allocation7]   ;;  %s259_s23 = sshll.u32 %s547_s2, 4  ;;  %s260_s23 = int_to_ptr.hbm [resolvable:$true] %s259_s23 }
   0xd   :  { %172 = vmatpush.bf16.msra.mxu0 %v352_v0  ;;  %400 = vmatpush.bf16.msra.mxu1 %v352_v0  ;;  %v350_v2 = vld [vmem:[#allocation5 + $0x28] sm:$0xff]  ;;  %v349_v3 = vld [vmem:[#allocation5 + $0x20] sm:$0xff]  ;;  %v348_v4 = vld [vmem:[#allocation5 + $0x18] sm:$0xff]  ;;  %s257_s1 = sshll.u32 %s511_s0, 4  ;;  %s258_s1 = int_to_ptr.vmem [resolvable:$true] %s257_s1 }
   0xe   :  { %401 = vmatpush.bf16.msra.mxu2 %v352_v0  ;;  %402 = vmatpush.bf16.msra.mxu3 %v352_v0  ;;  %v347_v5 = vld [vmem:[#allocation5 + $0x10] sm:$0xff]  ;;  %v346_v6 = vld [vmem:[#allocation5 + $0x8] sm:$0xff]  ;;  %v345_v7 = vld [vmem:[#allocation5] sm:$0xff] }
   0xf   :  { %v337_v8 = vld [vmem:[#allocation2] sm:$0xff]  ;;  %v339_v9 = vld [vmem:[#allocation2 + $0x10] sm:$0xff]  ;;  %v338_v12 = vld [vmem:[#allocation2 + $0x8] sm:$0xff] }
  0x10   :  { %v341_v10 = vld [vmem:[#allocation2 + $0x20] sm:$0xff]  ;;  %v343_v11 = vld [vmem:[#allocation2 + $0x30] sm:$0xff]  ;;  %v340_v13 = vld [vmem:[#allocation2 + $0x18] sm:$0xff] }
  0x11   :  { %173 = vmatpush.bf16.msra.mxu0 %v351_v1  ;;  %403 = vmatpush.bf16.msra.mxu1 %v351_v1  ;;  %v342_v14 = vld [vmem:[#allocation2 + $0x28] sm:$0xff]  ;;  %v344_v15 = vld [vmem:[#allocation2 + $0x38] sm:$0xff] }
  0x12   :  { %404 = vmatpush.bf16.msra.mxu2 %v351_v1  ;;  %405 = vmatpush.bf16.msra.mxu3 %v351_v1 }
  0x15   :  { %174 = vmatpush.bf16.msra.mxu0 %v350_v2  ;;  %406 = vmatpush.bf16.msra.mxu1 %v350_v2 }
  0x16   :  { %407 = vmatpush.bf16.msra.mxu2 %v350_v2  ;;  %408 = vmatpush.bf16.msra.mxu3 %v350_v2 }
  0x19   :  { %175 = vmatpush.bf16.msra.mxu0 %v349_v3  ;;  %409 = vmatpush.bf16.msra.mxu1 %v349_v3 }
  0x1a   :  { %410 = vmatpush.bf16.msra.mxu2 %v349_v3  ;;  %411 = vmatpush.bf16.msra.mxu3 %v349_v3 }
  0x1d   :  { %176 = vmatpush.bf16.msra.mxu0 %v348_v4  ;;  %412 = vmatpush.bf16.msra.mxu1 %v348_v4 }
  0x1e   :  { %413 = vmatpush.bf16.msra.mxu2 %v348_v4  ;;  %414 = vmatpush.bf16.msra.mxu3 %v348_v4 }
  0x21   :  { %177 = vmatpush.bf16.msra.mxu0 %v347_v5  ;;  %415 = vmatpush.bf16.msra.mxu1 %v347_v5 }
  0x22   :  { %416 = vmatpush.bf16.msra.mxu2 %v347_v5  ;;  %417 = vmatpush.bf16.msra.mxu3 %v347_v5 }
  0x25   :  { %178 = vmatpush.bf16.msra.mxu0 %v346_v6  ;;  %418 = vmatpush.bf16.msra.mxu1 %v346_v6 }
  0x26   :  { %419 = vmatpush.bf16.msra.mxu2 %v346_v6  ;;  %420 = vmatpush.bf16.msra.mxu3 %v346_v6 }
  0x29   :  { %179 = vmatpush.bf16.msra.mxu0 %v345_v7  ;;  %421 = vmatpush.bf16.msra.mxu1 %v345_v7 }
  0x2a   :  { %422 = vmatpush.bf16.msra.mxu2 %v345_v7  ;;  %423 = vmatpush.bf16.msra.mxu3 %v345_v7 }
  0x2c   :  { %180 = vmatmul.bf16.vlgmr.msra.gmra.mxu0 %v337_v8  ;;  %190 = vmatmul.bf16.vlgmr.msra.gmra.mxu1 %v339_v9 }
  0x2d   :  { %200 = vmatmul.bf16.vlgmr.msra.gmra.mxu2 %v341_v10  ;;  %210 = vmatmul.bf16.vlgmr.msra.gmra.mxu3 %v343_v11 }
  0x3c   :  { %185 = vmatmul.bf16.gmra.mxu0 %v338_v12  ;;  %195 = vmatmul.bf16.gmra.mxu1 %v340_v13 }
  0x3d   :  { %205 = vmatmul.bf16.gmra.mxu2 %v342_v14  ;;  %215 = vmatmul.bf16.gmra.mxu3 %v344_v15 }
  0xa9   :  { %v181_v16 = vpop.f32.mrf.mxu0  ;;  %v191_v17 = vpop.f32.mrf.mxu1 }
  0xb0   :  { %v201_v18 = vpop.f32.mrf.mxu2  ;;  %v211_v19 = vpop.f32.mrf.mxu3 }
  0xb1   :  { %v183_v20 = vpop.f32.mrf.mxu0  ;;  %v193_v21 = vpop.f32.mrf.mxu1 }
  0xb2   :  { %v356_v22 = vpack.c.bf16 %v183_v20, %v181_v16  ;;  %v366_v23 = vpack.c.bf16 %v193_v21, %v191_v17 }
  0xb4   :  { %357 = vst [vmem:[#allocation7] sm:$0xff] %v356_v22  }
  0xb5   :  { %394 = vst [vmem:[#allocation7 + $0x10] sm:$0xff] %v366_v23  }
  0xb8   :  { %v203_v24 = vpop.f32.mrf.mxu2  ;;  %v213_v25 = vpop.f32.mrf.mxu3 }
  0xb9   :  { %v376_v26 = vpack.c.bf16 %v203_v24, %v201_v18  ;;  %v386_v27 = vpack.c.bf16 %v213_v25, %v211_v19  ;;  %v186_v28 = vpop.f32.mrf.mxu0  ;;  %v196_v29 = vpop.f32.mrf.mxu1 }
  0xbb   :  { %396 = vst [vmem:[#allocation7 + $0x20] sm:$0xff] %v376_v26  }
  0xbc   :  { %398 = vst [vmem:[#allocation7 + $0x30] sm:$0xff] %v386_v27  }
  0xc0   :  { %v206_v30 = vpop.f32.mrf.mxu2  ;;  %v216_v31 = vpop.f32.mrf.mxu3 }
  0xc1   :  { %v188_v32 = vpop.f32.mrf.mxu0  ;;  %v198_v33 = vpop.f32.mrf.mxu1 }
  0xc2   :  { %v361_v34 = vpack.c.bf16 %v188_v32, %v186_v28  ;;  %v371_v35 = vpack.c.bf16 %v198_v33, %v196_v29 }
  0xc4   :  { %393 = vst [vmem:[#allocation7 + $0x8] sm:$0xff] %v361_v34  }
  0xc5   :  { %395 = vst [vmem:[#allocation7 + $0x18] sm:$0xff] %v371_v35  }
  0xc8   :  { %v208_v36 = vpop.f32.mrf.mxu2  ;;  %v218_v37 = vpop.f32.mrf.mxu3 }
  0xc9   :  { %v381_v38 = vpack.c.bf16 %v208_v36, %v206_v30  ;;  %v391_v39 = vpack.c.bf16 %v218_v37, %v216_v31 }
  0xcb   :  { %397 = vst [vmem:[#allocation7 + $0x28] sm:$0xff] %v381_v38  }
  0xcc   :  { %399 = vst [vmem:[#allocation7 + $0x38] sm:$0xff] %v391_v39  }
  0xcd   :  { %265 = dma.vmem_to_hbm [thread:$0]  %s258_s1, 1024, %s260_s23, [#allocation4], %s508_s17, %s508_s17, %s509_s18  }
  0xce   :  { %505 = dma.done.wait [#allocation4], 1024  }
  0xcf   :  { %506 = vsyncadd [#allocation4], 4294966272 }
  0xd0   :  { %270 = vsyncpa [#allocation3], 1 }
  0xd1   :  { %271 = vsyncpa [#allocation6], 1 }
  0xd2   :  { %272 = vsyncpa [#allocation4], 1 }

</bundles_post_ra>
